<compile_context>
chip_gen: v5e
topology: v5e:2x2
jax: 0.10.0
libtpu: 0.0.40
codegen_flags: <defaults>
</compile_context>

<pallas_src>
import math

import jax
import jax.numpy as jnp
from jax.experimental import pallas as pl
from jax.experimental.pallas import tpu as pltpu


def make_trig_pos_weight(embedding_number, dimension, padding_idx=None,
                         dtype=jnp.float32):
    """Deterministically build the sinusoidal table (same math as torch __init__).

    Build it in the runtime dtype so forward never has to cast the table.
    """
    position = jnp.arange(0, embedding_number, dtype=jnp.float32)[:, None]       # (E, 1)
    sin_mult = jnp.exp(-(math.log(10000.0) / dimension)
                       * jnp.arange(0, dimension, 2, dtype=jnp.float32))          # (D/2,)
    cos_mult = jnp.exp(-(math.log(10000.0) / dimension)
                       * jnp.arange(1, dimension, 2, dtype=jnp.float32))          # (D/2,)
    sin_w = jnp.sin(position * sin_mult)                                          # (E, D/2)
    cos_w = jnp.cos(position * cos_mult)                                          # (E, D/2)
    weight = jnp.zeros((embedding_number, dimension), dtype=jnp.float32)
    weight = weight.at[:, 0::2].set(sin_w)
    weight = weight.at[:, 1::2].set(cos_w)
    if padding_idx is None:
        # Faithful to torch's quirky `weight[None] = 0`, which zeroes the whole
        # table when padding_idx is None.
        # TODO(synk): confirm zeroing the entire table is the intended behavior.
        weight = jnp.zeros_like(weight)
    else:
        weight = weight.at[padding_idx].set(0.0)
    return weight.astype(dtype)


def _add_pe_kernel(x_ref, w_ref, o_ref):
    # x_ref/o_ref: (kb, ts, lane); w_ref: (ts_w, lane) with ts_w >= ts.
    # Static slice of the first ts weight rows (identity in the common case),
    # then broadcast over the kb folded batch elements. dtype promotion
    # (e.g. bf16 x + f32 table) happens here, matching torch semantics.
    ts = x_ref.shape[1]
    w = w_ref[:ts, :]
    o_ref[...] = (x_ref[...] + w[None, :, :]).astype(o_ref.dtype)


def _choose_layout(seq, dim, table_rows):
    """Pick a lane-dense (rows, lane) view of both the activation slab (S*D)
    and the FULL table (E*D) so no wrapper-side slice/copy of the weight is
    needed.  Returns (rows, lane, rows_full, lane_dense)."""
    total = seq * dim
    full_total = table_rows * dim
    g = math.gcd(total, full_total)
    if g % 128 != 0:
        # TODO(synk): no multiple-of-128 lane divides both S*D and E*D; this
        # fallback keeps (S, D) blocks (full-D last dim) and pays masked
        # partial stores when D < 128.
        return seq, dim, table_rows, False
    lanes = [l for l in range(128, min(g, 4096) + 1, 128) if g % l == 0]
    best = None
    for l in lanes:                       # widest lane that still leaves >=8 rows
        if total // l >= 8:
            best = l
    if best is None:                      # tiny slab: just take the widest lane
        best = lanes[-1]
    return total // best, best, full_total // best, True


def _tile_target_bytes():
    """Generation-aware per-block DMA target: bigger tiles amortize the
    ~0.35us/step overhead on high-bandwidth chips (v6e/v7x); stay at 2 MiB on
    older generations so double-buffered blocks fit comfortably."""
    try:
        kind = jax.devices()[0].device_kind.lower()
    except Exception:
        return 2 << 20
    if any(v in kind for v in ("v2", "v3", "v4", "v5")):
        return 2 << 20
    return 4 << 20


def _choose_row_tile(rows, lane, itemsize, target_bytes):
    """Row tile: multiple of the dtype's sublane packing, ~target_bytes per
    block, preferring a tile that divides rows so the tail isn't a masked
    partial block."""
    packing = 8 * max(1, 4 // itemsize)          # f32: 8, bf16: 16, int8/fp8: 32
    per_row = lane * itemsize
    ts = (target_bytes // max(per_row, 1)) // packing * packing
    ts = max(packing, ts)
    if ts >= rows:
        return rows
    c = ts
    while c >= max(packing, ts // 2):            # don't shrink below half target
        if rows % c == 0:
            return c
        c -= packing
    return ts


def _forward_pallas(x, weight, *, tile_bytes=None, donate_x=True):
    *lead, S, D = x.shape
    E = weight.shape[0]
    B = 1
    for d in lead:
        B *= int(d)
    out_dtype = jnp.result_type(x.dtype, weight.dtype)   # torch-style promotion

    rows, lane, rows_full, _ = _choose_layout(S, D, E)
    xr = x.reshape(B, rows, lane)                 # pure view math, no copy
    wr = weight.reshape(rows_full, lane)          # FULL table, no slice/cast pass

    target = int(tile_bytes) if tile_bytes is not None else _tile_target_bytes()
    ts = _choose_row_tile(rows, lane, x.dtype.itemsize, target)
    n_s = -(-rows // ts)

    if n_s == 1:
        # Small slab: fold several batch elements per block so each grid step
        # still moves ~target bytes instead of B tiny steps.
        slab = rows * lane * x.dtype.itemsize
        kb = max(1, min(B, target // max(slab, 1)))
    else:
        kb = 1
    n_b = -(-B // kb)

    # Weight block row count: equal to ts when 8-aligned; otherwise (only when
    # the whole slab is one tile with rows < 8) round up to a legal block and
    # let the kernel statically slice the first ts rows.
    if ts % 8 == 0 or ts == rows_full:
        ts_w = ts
    else:
        ts_w = min(-(-ts // 8) * 8, rows_full)
    assert n_s == 1 or ts_w == ts

    # Alias x's HBM buffer for the output when dtypes match. Inside jit with x
    # dead after the add this drops the separate output allocation; XLA inserts
    # a copy if x is still live, so it is always safe.
    aliases = {0: 0} if (donate_x and out_dtype == x.dtype) else {}

    # Explicit VMEM budget: double-buffered x/out/weight blocks + headroom.
    need = 2 * (kb * ts * lane * (x.dtype.itemsize + jnp.dtype(out_dtype).itemsize)
                + ts_w * lane * weight.dtype.itemsize)
    vmem_limit = int(min(max(need + (4 << 20), 16 << 20), 48 << 20))

    out = pl.pallas_call(
        _add_pe_kernel,
        out_shape=jax.ShapeDtypeStruct((B, rows, lane), out_dtype),
        grid_spec=pltpu.PrefetchScalarGridSpec(
            num_scalar_prefetch=0,
            # batch innermost: the weight block index is constant across the
            # inner loop so Pallas skips re-DMA of the invariant weight tile.
            grid=(n_s, n_b),
            in_specs=[
                pl.BlockSpec((kb, ts, lane), lambda s, b: (b, s, 0)),
                pl.BlockSpec((ts_w, lane), lambda s, b: (s, 0)),
            ],
            out_specs=pl.BlockSpec((kb, ts, lane), lambda s, b: (b, s, 0)),
        ),
        input_output_aliases=aliases,
        compiler_params=pltpu.CompilerParams(
            dimension_semantics=("parallel", "parallel"),
            vmem_limit_bytes=vmem_limit,
        ),
    )(xr, wr)
    return out.reshape(*lead, S, D)


_PALLAS_MIN_BYTES = 1 << 20  # below ~1 MiB, a fused XLA add beats a pallas_call


def trig_positional_embedding_forward(x, weight, *, force_pallas=False,
                                      tile_bytes=None, donate_x=True):
    """x: (..., S, D); weight: (E, D) with E >= S. Returns x + weight[:S]."""
    S = x.shape[-2]
    if weight.shape[0] < S:
        raise ValueError(
            f"sequence length {S} exceeds positional table size {weight.shape[0]}")
    if x.shape[-1] != weight.shape[-1]:
        raise ValueError("embedding dimension mismatch between x and weight")

    nbytes = x.size * x.dtype.itemsize
    if not force_pallas and nbytes < _PALLAS_MIN_BYTES:
        # Tiny problem: let XLA fuse the add into the surrounding graph.
        return x + weight[:S]
    return _forward_pallas(x, weight, tile_bytes=tile_bytes, donate_x=donate_x)


if __name__ == "__main__":
    key = jax.random.PRNGKey(0)
    k1, k2, k3 = jax.random.split(key, 3)

    # --- Config 1: module's typical tiny demo shape (D=32) -> lane-dense
    #     (rows=1, lane=256) view, batch folded into one block, f32.
    E1, D1, pad1 = 16, 32, 0
    B1, S1 = 2, 8
    x1 = jax.random.normal(k1, (B1, S1, D1), dtype=jnp.float32)
    w1 = make_trig_pos_weight(E1, D1, pad1)
    ref1 = x1 + w1[:S1]

    # Dispatcher sanity first (tiny -> fused XLA path), before any aliased call.
    out1_auto = jax.block_until_ready(trig_positional_embedding_forward(x1, w1))
    assert jnp.allclose(out1_auto, ref1, atol=1e-6)

    out1 = jax.block_until_ready(
        trig_positional_embedding_forward(x1, w1, force_pallas=True))
    assert out1.shape == x1.shape and out1.dtype == x1.dtype
    assert jnp.allclose(out1, ref1, atol=1e-6), "mismatch vs reference (f32 path)"

    # --- Config 2: bf16 end-to-end with the table built directly in bf16 (no
    #     per-call cast); tiny tile override exercises the multi-step
    #     (row_tiles, batch) grid with the invariant weight tile reused.
    E2, D2, pad2 = 768, 256, 5
    B2, S2 = 2, 512
    x2 = jax.random.normal(k2, (B2, S2, D2), dtype=jnp.bfloat16)
    w2 = make_trig_pos_weight(E2, D2, pad2, dtype=jnp.bfloat16)
    ref2 = x2 + w2[:S2]
    out2 = jax.block_until_ready(
        trig_positional_embedding_forward(x2, w2, force_pallas=True,
                                          tile_bytes=64 << 10))
    assert out2.shape == x2.shape and out2.dtype == x2.dtype
    assert jnp.allclose(out2.astype(jnp.float32), ref2.astype(jnp.float32),
                        atol=1e-2), "mismatch vs reference (bf16 path)"

    # --- Config 3: fallback (S, D) layout (no 128-lane view divides S*D) and
    #     torch-style promotion (bf16 x + f32 table -> f32 out, no aliasing).
    E3, D3, pad3 = 16, 32, 1
    B3, S3 = 3, 7
    x3 = jax.random.normal(k3, (B3, S3, D3), dtype=jnp.bfloat16)
    w3 = make_trig_pos_weight(E3, D3, pad3)              # f32 table
    ref3 = x3 + w3[:S3]                                  # promotes to f32, as torch does
    out3 = jax.block_until_ready(
        trig_positional_embedding_forward(x3, w3, force_pallas=True))
    assert out3.shape == x3.shape and out3.dtype == jnp.float32
    assert jnp.allclose(out3, ref3, atol=1e-5), "mismatch vs reference (promotion path)"

    print("KERNEL_OK")
</pallas_src>

<mosaic_0001>
module attributes {stable_mosaic.version = 11 : i64} {
  func.func @_add_pe_kernel(%arg0: i32, %arg1: i32, %arg2: memref<2x1x256xf32, #tpu.memory_space<vmem>>, %arg3: memref<2x256xf32, #tpu.memory_space<vmem>>, %arg4: memref<2x1x256xf32, #tpu.memory_space<vmem>>) attributes {dimension_semantics = [#tpu.dimension_semantics<parallel>, #tpu.dimension_semantics<parallel>], iteration_bounds = array<i64: 1, 1>, scalar_prefetch = 0 : i64, scratch_operands = 0 : i64, tpu.core_type = #tpu.core_type<tc>, window_params = [{transform_indices = @transform_0, window_bounds = array<i64: 2, 1, 256>}, {transform_indices = @transform_1, window_bounds = array<i64: 2, 256>}, {transform_indices = @transform_2, window_bounds = array<i64: 2, 1, 256>}]} {
    %c0 = arith.constant 0 : index
    %c0_0 = arith.constant 0 : index
    %0 = vector.load %arg3[%c0, %c0_0] : memref<2x256xf32, #tpu.memory_space<vmem>>, vector<1x256xf32>
    %c0_1 = arith.constant 0 : index
    %c0_2 = arith.constant 0 : index
    %c0_3 = arith.constant 0 : index
    %1 = vector.load %arg2[%c0_1, %c0_2, %c0_3] : memref<2x1x256xf32, #tpu.memory_space<vmem>>, vector<2x1x256xf32>
    %2 = vector.shape_cast %0 : vector<1x256xf32> to vector<1x1x256xf32>
    %3 = vector.broadcast %2 : vector<1x1x256xf32> to vector<2x1x256xf32>
    %4 = arith.addf %1, %3 : vector<2x1x256xf32>
    %c0_4 = arith.constant 0 : index
    %c0_5 = arith.constant 0 : index
    %c0_6 = arith.constant 0 : index
    %5 = vector.load %arg4[%c0_4, %c0_5, %c0_6] : memref<2x1x256xf32, #tpu.memory_space<vmem>>, vector<2x1x256xf32>
    tpu.vector_store %arg4[%c0_4, %c0_5, %c0_6], %4 {strides = array<i32>} : memref<2x1x256xf32, #tpu.memory_space<vmem>>, vector<2x1x256xf32>,
    return
  }
  func.func @transform_0(%arg0: i32, %arg1: i32) -> (i32, i32, i32) {
    %c0_i32 = arith.constant 0 : i32
    %c0_i32_0 = arith.constant 0 : i32
    return %arg1, %arg0, %c0_i32 : i32, i32, i32
  }
  func.func @transform_1(%arg0: i32, %arg1: i32) -> (i32, i32) {
    %c0_i32 = arith.constant 0 : i32
    %c0_i32_0 = arith.constant 0 : i32
    return %arg0, %c0_i32 : i32, i32
  }
  func.func @transform_2(%arg0: i32, %arg1: i32) -> (i32, i32, i32) {
    %c0_i32 = arith.constant 0 : i32
    %c0_i32_0 = arith.constant 0 : i32
    return %arg1, %arg0, %c0_i32 : i32, i32, i32
  }
}

</mosaic_0001>

<bundles_post_ra>
// kernel: tpu_custom_call.1
= control target key start
LH: loop header
LB: loop body
LE: loop exit
PB: predicated region body
PF: predicated region fallthrough
CT: control target
= control target key end

     0   :  { %7 = vsyncpa [#allocation3], 0  ;;  %s142_s0 = inlined_call_operand.hbm [shape: f32[2,1,256], index: 0, kind: input, shape index: {}, may-alias: {0,2}]   ;;  %s143_s1 = inlined_call_operand.vmem [shape: f32[2,256], index: 1, kind: input, shape index: {}]   ;;  %s144_s2 = inlined_call_operand.hbm [shape: f32[2,1,256], index: 2, kind: output, shape index: {}, may-alias: {0,2}]  }
   0x1   :  { %8 = vsyncpa [#allocation4], 0  ;;  %s13_s11 = sshll.u32 %s142_s0, 4  ;;  %s114_s12 = smov [#allocation2]   ;;  %s14_s11 = int_to_ptr.hbm [resolvable:$true] %s13_s11 }
   0x2   :  { %s15_s13 = sshll.u32 %s114_s12, 4  ;;  %s115_s14 = smov 32   ;;  %s16_s13 = int_to_ptr.vmem [resolvable:$true] %s15_s13 }
   0x3   :  { %s116_s15 = smov 2  }
   0x4   :  { %21 = dma.hbm_to_vmem [thread:$0]  %s14_s11, 64, %s16_s13, [#allocation3], %s115_s14, %s115_s14, %s116_s15  }
   0x5   :  { %110 = dma.done.wait [#allocation3], 64  }
   0x6   :  { %111 = vsyncadd [#allocation3], 4294967232  ;;  %v33_v0 = vlaneseq  ;;  %s117_s16 = smov [#allocation5]   ;;  %s45_s20 = sshll.u32 %s144_s2, 4  ;;  %v29_v2 = vld [vmem:[#allocation2] sm:$0x3]  ;;  %s46_s20 = int_to_ptr.hbm [resolvable:$true] %s45_s20 }
   0x7   :  { %s43_s17 = sshll.u32 %s117_s16, 4  ;;  %v28_v1 = vld [vmem:[%s143_s1] ss:$2 sm:$0x3]  ;;  %s44_s17 = int_to_ptr.vmem [resolvable:$true] %s43_s17 }
   0x8   :  { %vm35_vm0 = vcmp.lt.s32.totalorder %v33_v0, 256  ;;  %v31_v3 = vadd.f32 %v29_v2, %v28_v1  ;;  %v30_v4 = vld [vmem:[#allocation2 + $0x2] sm:$0x3] }
   0x9   :  { %v32_v5 = vadd.f32 %v30_v4, %v28_v1 }
   0xa   :  { %37 = vst.msk [vmem:[#allocation5] sm:$0x3] %vm35_vm0, %v31_v3 }
   0xb   :  { %38 = vst.msk [vmem:[#allocation5 + $0x2] sm:$0x3] %vm35_vm0, %v32_v5 }
   0xc   :  { %51 = dma.vmem_to_hbm [thread:$0]  %s44_s17, 64, %s46_s20, [#allocation4], %s115_s14, %s115_s14, %s116_s15  }
   0xd   :  { %112 = dma.done.wait [#allocation4], 64  }
   0xe   :  { %113 = vsyncadd [#allocation4], 4294967232 }
   0xf   :  { %56 = vsyncpa [#allocation3], 1 }
  0x10   :  { %57 = vsyncpa [#allocation4], 1 }

</bundles_post_ra>
